<compile_context>
chip_gen: v5e
topology: v5e:2x2
jax: 0.10.0
libtpu: 0.0.40
codegen_flags: <defaults>
</compile_context>

<pallas_src>
import functools

import jax
import jax.numpy as jnp
from jax.experimental import pallas as pl
from jax.experimental.pallas import tpu as pltpu


def _census_kernel(x_ref, mask_ref, o_ref, *, shifts):
    """x_ref: (Rb, L) f32, mask_ref: (1, L) i32, o_ref: (Rb, L) i32."""
    x = x_ref[...]
    census = jnp.zeros(o_ref.shape, jnp.int32)
    nbits = len(shifts)
    for idx, s in enumerate(shifts):              # static unrolled: 8 (k=3) / 24 (k=5) taps
        nb = pltpu.roll(x, shift=s, axis=1)       # nb[..., i] == x[..., i + offset] (XLU)
        w = jnp.int32(1 << (nbits - 1 - idx))     # MSB-first weight, same order as torch
        census = census + jnp.where(nb >= x, w, jnp.int32(0))
    o_ref[...] = census * mask_ref[...]           # zero the border (broadcast over rows)


def _round_up(a, b):
    return (a + b - 1) // b * b


def census_transform(img, kernel_size):
    """Pallas census transform matching the PyTorch reference (NCHW in, int32 NCHW out)."""
    assert img.ndim == 4
    if kernel_size != 3 and kernel_size != 5:
        raise NotImplementedError
    N, C, H, W = img.shape
    m = (kernel_size - 1) // 2
    L = H * W
    R = N * C

    x2 = img.reshape(R, L).astype(jnp.float32)

    # Row tiling: sublane-aligned (multiple of 8) blocks, a few MiB at most.
    # TODO(synk): for very large images also tile the flattened spatial (lane) axis
    # with a W-row halo instead of keeping one full image per block row.
    R8 = _round_up(R, 8)
    rows_cap = max(8, ((4 << 20) // (4 * L)) // 8 * 8)
    Rb = max(8, min(R8, rows_cap, 512))
    R_pad = _round_up(R8, Rb)
    if R_pad != R:
        x2 = jnp.pad(x2, ((0, R_pad - R), (0, 0)))

    # Validity mask for interior pixels; torch zero-pads the margin border.
    yy = jnp.arange(H)
    xx = jnp.arange(W)
    valid = ((yy >= m) & (yy < H - m))[:, None] & ((xx >= m) & (xx < W - m))[None, :]
    mask = valid.astype(jnp.int32).reshape(1, L)

    # Offsets in the exact (MSB-first) order of the reference implementation.
    offsets = [(u, v) for v in range(kernel_size) for u in range(kernel_size)
               if not u == m == v]
    # neighbor flat offset o = (v - m) * W + (u - m); roll by (-o) % L gives x[i + o].
    shifts = tuple(int((-((v - m) * W + (u - m))) % L) for (u, v) in offsets)
    taps = len(shifts)

    kernel = functools.partial(_census_kernel, shifts=shifts)
    out = pl.pallas_call(
        kernel,
        out_shape=jax.ShapeDtypeStruct((R_pad, L), jnp.int32),
        grid_spec=pltpu.PrefetchScalarGridSpec(
            num_scalar_prefetch=0,
            grid=(R_pad // Rb,),
            in_specs=[pl.BlockSpec((Rb, L), lambda i: (i, 0)),
                      pl.BlockSpec((1, L), lambda i: (0, 0))],
            out_specs=pl.BlockSpec((Rb, L), lambda i: (i, 0)),
        ),
        compiler_params=pltpu.CompilerParams(
            dimension_semantics=("parallel",)),
        cost_estimate=pl.CostEstimate(
            flops=R_pad * L * (3 * taps + 1),
            transcendentals=0,
            bytes_accessed=R_pad * L * 4 * 2 + L * 4),
    )(x2, mask)

    return out[:R].reshape(N, C, H, W)


class CensusTransform:
    """Mirror of the PyTorch nn.Module."""

    def __init__(self, kernel_size):
        self._kernel_size = kernel_size

    def __call__(self, x):
        return census_transform(x, self._kernel_size)


# --- pure-JAX reference (straight port of the torch code, for the check) ----------
def _census_ref(img, k):
    n, c, h, w = img.shape
    m = (k - 1) // 2
    center = img[:, :, m:h - m, m:w - m]
    census = jnp.zeros((n, c, h - k + 1, w - k + 1), jnp.int32)
    offsets = [(u, v) for v in range(k) for u in range(k) if not u == m == v]
    for u, v in offsets:
        nb = img[:, :, v:v + h - k + 1, u:u + w - k + 1]
        census = census * 2 + (nb >= center).astype(jnp.int32)
    return jnp.pad(census, ((0, 0), (0, 0), (m, m), (m, m)))


if __name__ == "__main__":
    key = jax.random.PRNGKey(0)
    N, C, H, W = 2, 4, 16, 16
    x = jax.random.normal(key, (N, C, H, W), jnp.float32)

    for ks in (3, 5):
        model = CensusTransform(ks)
        out = jax.block_until_ready(model(x))
        assert out.shape == (N, C, H, W) and out.dtype == jnp.int32
        ref = _census_ref(x, ks)
        assert bool(jnp.all(out == ref)), f"mismatch for kernel_size={ks}"

    print("KERNEL_OK")
</pallas_src>

<mosaic_0001>
module attributes {stable_mosaic.version = 11 : i64} {
  func.func @_census_kernel(%arg0: i32, %arg1: memref<8x256xf32, #tpu.memory_space<vmem>>, %arg2: memref<1x256xi32, #tpu.memory_space<vmem>>, %arg3: memref<8x256xi32, #tpu.memory_space<vmem>>) attributes {dimension_semantics = [#tpu.dimension_semantics<parallel>], iteration_bounds = array<i64: 1>, scalar_prefetch = 0 : i64, scratch_operands = 0 : i64, tpu.core_type = #tpu.core_type<tc>, window_params = [{transform_indices = @transform_0, window_bounds = array<i64: 8, 256>}, {pipeline_mode = #tpu.pipeline_mode<synchronous>, transform_indices = @transform_1, window_bounds = array<i64: 1, 256>}, {transform_indices = @transform_2, window_bounds = array<i64: 8, 256>}]} {
    %c0 = arith.constant 0 : index
    %c0_0 = arith.constant 0 : index
    %0 = vector.load %arg1[%c0, %c0_0] : memref<8x256xf32, #tpu.memory_space<vmem>>, vector<8x256xf32>
    %c0_i32 = arith.constant 0 : i32
    %1 = vector.broadcast %c0_i32 : i32 to vector<8x256xi32>
    %c17_i32 = arith.constant 17 : i32
    %2 = tpu.dynamic_rotate %0 by %c17_i32 dim 1 : vector<8x256xf32>, i32 -> vector<8x256xf32>
    %3 = arith.cmpf oge, %2, %0 : vector<8x256xf32>
    %c128_i32 = arith.constant 128 : i32
    %c0_i32_1 = arith.constant 0 : i32
    %4 = vector.broadcast %c128_i32 : i32 to vector<8x256xi32>
    %5 = vector.broadcast %c0_i32_1 : i32 to vector<8x256xi32>
    %6 = arith.select %3, %4, %5 : vector<8x256xi1>, vector<8x256xi32>
    %7 = arith.addi %1, %6 : vector<8x256xi32>
    %c16_i32 = arith.constant 16 : i32
    %8 = tpu.dynamic_rotate %0 by %c16_i32 dim 1 : vector<8x256xf32>, i32 -> vector<8x256xf32>
    %9 = arith.cmpf oge, %8, %0 : vector<8x256xf32>
    %c64_i32 = arith.constant 64 : i32
    %c0_i32_2 = arith.constant 0 : i32
    %10 = vector.broadcast %c64_i32 : i32 to vector<8x256xi32>
    %11 = vector.broadcast %c0_i32_2 : i32 to vector<8x256xi32>
    %12 = arith.select %9, %10, %11 : vector<8x256xi1>, vector<8x256xi32>
    %13 = arith.addi %7, %12 : vector<8x256xi32>
    %c15_i32 = arith.constant 15 : i32
    %14 = tpu.dynamic_rotate %0 by %c15_i32 dim 1 : vector<8x256xf32>, i32 -> vector<8x256xf32>
    %15 = arith.cmpf oge, %14, %0 : vector<8x256xf32>
    %c32_i32 = arith.constant 32 : i32
    %c0_i32_3 = arith.constant 0 : i32
    %16 = vector.broadcast %c32_i32 : i32 to vector<8x256xi32>
    %17 = vector.broadcast %c0_i32_3 : i32 to vector<8x256xi32>
    %18 = arith.select %15, %16, %17 : vector<8x256xi1>, vector<8x256xi32>
    %19 = arith.addi %13, %18 : vector<8x256xi32>
    %c1_i32 = arith.constant 1 : i32
    %20 = tpu.dynamic_rotate %0 by %c1_i32 dim 1 : vector<8x256xf32>, i32 -> vector<8x256xf32>
    %21 = arith.cmpf oge, %20, %0 : vector<8x256xf32>
    %c16_i32_4 = arith.constant 16 : i32
    %c0_i32_5 = arith.constant 0 : i32
    %22 = vector.broadcast %c16_i32_4 : i32 to vector<8x256xi32>
    %23 = vector.broadcast %c0_i32_5 : i32 to vector<8x256xi32>
    %24 = arith.select %21, %22, %23 : vector<8x256xi1>, vector<8x256xi32>
    %25 = arith.addi %19, %24 : vector<8x256xi32>
    %c255_i32 = arith.constant 255 : i32
    %26 = tpu.dynamic_rotate %0 by %c255_i32 dim 1 : vector<8x256xf32>, i32 -> vector<8x256xf32>
    %27 = arith.cmpf oge, %26, %0 : vector<8x256xf32>
    %c8_i32 = arith.constant 8 : i32
    %c0_i32_6 = arith.constant 0 : i32
    %28 = vector.broadcast %c8_i32 : i32 to vector<8x256xi32>
    %29 = vector.broadcast %c0_i32_6 : i32 to vector<8x256xi32>
    %30 = arith.select %27, %28, %29 : vector<8x256xi1>, vector<8x256xi32>
    %31 = arith.addi %25, %30 : vector<8x256xi32>
    %c241_i32 = arith.constant 241 : i32
    %32 = tpu.dynamic_rotate %0 by %c241_i32 dim 1 : vector<8x256xf32>, i32 -> vector<8x256xf32>
    %33 = arith.cmpf oge, %32, %0 : vector<8x256xf32>
    %c4_i32 = arith.constant 4 : i32
    %c0_i32_7 = arith.constant 0 : i32
    %34 = vector.broadcast %c4_i32 : i32 to vector<8x256xi32>
    %35 = vector.broadcast %c0_i32_7 : i32 to vector<8x256xi32>
    %36 = arith.select %33, %34, %35 : vector<8x256xi1>, vector<8x256xi32>
    %37 = arith.addi %31, %36 : vector<8x256xi32>
    %c240_i32 = arith.constant 240 : i32
    %38 = tpu.dynamic_rotate %0 by %c240_i32 dim 1 : vector<8x256xf32>, i32 -> vector<8x256xf32>
    %39 = arith.cmpf oge, %38, %0 : vector<8x256xf32>
    %c2_i32 = arith.constant 2 : i32
    %c0_i32_8 = arith.constant 0 : i32
    %40 = vector.broadcast %c2_i32 : i32 to vector<8x256xi32>
    %41 = vector.broadcast %c0_i32_8 : i32 to vector<8x256xi32>
    %42 = arith.select %39, %40, %41 : vector<8x256xi1>, vector<8x256xi32>
    %43 = arith.addi %37, %42 : vector<8x256xi32>
    %c239_i32 = arith.constant 239 : i32
    %44 = tpu.dynamic_rotate %0 by %c239_i32 dim 1 : vector<8x256xf32>, i32 -> vector<8x256xf32>
    %45 = arith.cmpf oge, %44, %0 : vector<8x256xf32>
    %c1_i32_9 = arith.constant 1 : i32
    %c0_i32_10 = arith.constant 0 : i32
    %46 = vector.broadcast %c1_i32_9 : i32 to vector<8x256xi32>
    %47 = vector.broadcast %c0_i32_10 : i32 to vector<8x256xi32>
    %48 = arith.select %45, %46, %47 : vector<8x256xi1>, vector<8x256xi32>
    %49 = arith.addi %43, %48 : vector<8x256xi32>
    %c0_11 = arith.constant 0 : index
    %c0_12 = arith.constant 0 : index
    %50 = vector.load %arg2[%c0_11, %c0_12] : memref<1x256xi32, #tpu.memory_space<vmem>>, vector<1x256xi32>
    %51 = vector.broadcast %50 : vector<1x256xi32> to vector<8x256xi32>
    %52 = arith.muli %49, %51 : vector<8x256xi32>
    %c0_13 = arith.constant 0 : index
    %c0_14 = arith.constant 0 : index
    %53 = vector.load %arg3[%c0_13, %c0_14] : memref<8x256xi32, #tpu.memory_space<vmem>>, vector<8x256xi32>
    tpu.vector_store %arg3[%c0_13, %c0_14], %52 {strides = array<i32>} : memref<8x256xi32, #tpu.memory_space<vmem>>, vector<8x256xi32>,
    return
  }
  func.func @transform_0(%arg0: i32) -> (i32, i32) {
    %c0_i32 = arith.constant 0 : i32
    %c0_i32_0 = arith.constant 0 : i32
    return %arg0, %c0_i32 : i32, i32
  }
  func.func @transform_1(%arg0: i32) -> (i32, i32) {
    %c0_i32 = arith.constant 0 : i32
    %c0_i32_0 = arith.constant 0 : i32
    %c0_i32_1 = arith.constant 0 : i32
    return %c0_i32, %c0_i32_0 : i32, i32
  }
  func.func @transform_2(%arg0: i32) -> (i32, i32) {
    %c0_i32 = arith.constant 0 : i32
    %c0_i32_0 = arith.constant 0 : i32
    return %arg0, %c0_i32 : i32, i32
  }
}

</mosaic_0001>

<bundles_post_ra>
// kernel: tpu_custom_call.1
= control target key start
LH: loop header
LB: loop body
LE: loop exit
PB: predicated region body
PF: predicated region fallthrough
CT: control target
= control target key end

     0   :  { %7 = vsyncpa [#allocation3], 0  ;;  %s359_s0 = inlined_call_operand.hbm [shape: f32[8,256], index: 0, kind: input, shape index: {}]   ;;  %s360_s1 = inlined_call_operand.hbm [shape: s32[1,256], index: 1, kind: input, shape index: {}]   ;;  %s361_s2 = inlined_call_operand.hbm [shape: s32[8,256], index: 2, kind: output, shape index: {}]  }
   0x1   :  { %8 = vsyncpa [#allocation6], 0 }
   0x2   :  { %9 = vsyncpa [#allocation4], 0  ;;  %s15_s11 = sshll.u32 %s359_s0, 4  ;;  %s261_s12 = smov [#allocation2]   ;;  %s16_s11 = int_to_ptr.hbm [resolvable:$true] %s15_s11 }
   0x3   :  { %s17_s13 = sshll.u32 %s261_s12, 4  ;;  %s26_s16 = sshll.u32 %s360_s1, 4  ;;  %s18_s13 = int_to_ptr.vmem [resolvable:$true] %s17_s13  ;;  %s27_s16 = int_to_ptr.hbm [resolvable:$true] %s26_s16 }
   0x4   :  { %20 = dma.hbm_to_vmem [thread:$0]  %s16_s11, 256, %s18_s13, [#allocation3]  }
   0x5   :  { %s262_s17 = smov [#allocation5]  }
   0x6   :  { %s28_s18 = sshll.u32 %s262_s17, 4  ;;  %s29_s18 = int_to_ptr.vmem [resolvable:$true] %s28_s18 }
   0x7   :  { %31 = dma.hbm_to_vmem [thread:$0]  %s27_s16, 32, %s29_s18, [#allocation6]  }
   0x8   :  { %255 = dma.done.wait [#allocation3], 256  }
   0x9   :  { %256 = vsyncadd [#allocation3], 4294967040 }
   0xa   :  { %257 = dma.done.wait [#allocation6], 32  }
   0xb   :  { %258 = vsyncadd [#allocation6], 4294967264  ;;  %v294_v0 = vld [vmem:[#allocation2] sm:$0xff]  ;;  %s263_s0 = smov 16   ;;  %s264_s19 = smov 17   ;;  %v299_v1 = vld [vmem:[#allocation2 + $0x8] sm:$0xff]  ;;  %v46_v5 = vlaneseq }
   0xc   :  { %55 = vrot.lane.b32.xlu1 %v294_v0, %s263_s0  ;;  %42 = vrot.lane.b32.xlu0 %v294_v0, %s264_s19  ;;  %s265_s20 = smov 15   ;;  %s266_s1 = smov 1   ;;  %v271_v19 = vmov 0   ;;  %v146_v54 = vld [vmem:[#allocation5] sm:$0x3] }
   0xd   :  { %68 = vrot.lane.b32.xlu2 %v294_v0, %s265_s20  ;;  %s267_s21 = smov 127   ;;  %s268_s22 = smov 113   ;;  %v314_v9 = vand.u32 127, %v46_v5  ;;  %v147_v60 = vperm.slane %v146_v54, 0  ;;  %v148_v61 = vperm.slane %v146_v54, 1 }
   0xe   :  { %s269_s23 = smov 112   ;;  %s270_s24 = smov 111  }
   0xf   :  { %vm59_vm0 = vcmp.lt.s32.totalorder %v314_v9, 16  ;;  %vm48_vm1 = vcmp.lt.s32.totalorder %v314_v9, 17  ;;  %vm72_vm2 = vcmp.lt.s32.totalorder %v314_v9, 15  ;;  %vm85_vm7 = vcmp.lt.s32.totalorder %v314_v9, 1  ;;  %s272_s25 = smov [#allocation7]   ;;  %s160_s29 = sshll.u32 %s361_s2, 4  ;;  %s161_s29 = int_to_ptr.hbm [resolvable:$true] %s160_s29 }
  0x10   :  { %vm98_vm8 = vcmp.lt.s32.totalorder %v314_v9, 127  ;;  %vm111_vm11 = vcmp.lt.s32.totalorder %v314_v9, 113  ;;  %s158_s26 = sshll.u32 %s272_s25, 4  ;;  %s159_s26 = int_to_ptr.vmem [resolvable:$true] %s158_s26 }
  0x14   :  { %57 = vrot.lane.b32.xlu1 %v299_v1, %s263_s0  ;;  %44 = vrot.lane.b32.xlu0 %v299_v1, %s264_s19 }
  0x15   :  { %70 = vrot.lane.b32.xlu2 %v299_v1, %s265_s20 }
  0x1c   :  { %83 = vrot.lane.b32.xlu1 %v299_v1, %s266_s1  ;;  %81 = vrot.lane.b32.xlu0 %v294_v0, %s266_s1 }
  0x1d   :  { %94 = vrot.lane.b32.xlu2 %v294_v0, %s267_s21 }
  0x24   :  { %107 = vrot.lane.b32.xlu1 %v294_v0, %s268_s22  ;;  %96 = vrot.lane.b32.xlu0 %v299_v1, %s267_s21 }
  0x25   :  { %109 = vrot.lane.b32.xlu2 %v299_v1, %s268_s22 }
  0x2c   :  { %122 = vrot.lane.b32.xlu1 %v299_v1, %s269_s23  ;;  %120 = vrot.lane.b32.xlu0 %v294_v0, %s269_s23 }
  0x2d   :  { %133 = vrot.lane.b32.xlu2 %v294_v0, %s270_s24 }
  0x34   :  { %135 = vrot.lane.b32.xlu0 %v299_v1, %s270_s24 }
  0x67   :  { %v69_v2 = vpop.permute.xlu2 %68 }
  0x6f   :  { %v71_v8 = vpop.permute.xlu2 %70 }
  0x70   :  { %v74_v17 = vsel %vm72_vm2, %v71_v8, %v69_v2  ;;  %v73_v18 = vsel %vm72_vm2, %v69_v2, %v71_v8 }
  0x71   :  { %vm75_vm9 = vcmp.ge.f32.partialorder %v74_v17, %v294_v0  ;;  %vm76_vm10 = vcmp.ge.f32.partialorder %v73_v18, %v299_v1 }
  0x72   :  { %v77_v33 = vsel %vm75_vm9, 32, %v271_v19  ;;  %v78_v34 = vsel %vm76_vm10, 32, %v271_v19 }
  0x77   :  { %v95_v14 = vpop.permute.xlu2 %94 }
  0x7e   :  { %v56_v3 = vpop.permute.xlu1 %55  ;;  %v43_v4 = vpop.permute.xlu0 %42 }
  0x7f   :  { %v110_v32 = vpop.permute.xlu2 %109 }
  0x86   :  { %v58_v6 = vpop.permute.xlu1 %57  ;;  %v45_v7 = vpop.permute.xlu0 %44 }
  0x87   :  { %v60_v12 = vsel %vm59_vm0, %v56_v3, %v58_v6  ;;  %v61_v13 = vsel %vm59_vm0, %v58_v6, %v56_v3  ;;  %v49_v15 = vsel %vm48_vm1, %v43_v4, %v45_v7  ;;  %v50_v16 = vsel %vm48_vm1, %v45_v7, %v43_v4  ;;  %v134_v53 = vpop.permute.xlu2 %133 }
  0x88   :  { %vm62_vm3 = vcmp.ge.f32.partialorder %v61_v13, %v294_v0  ;;  %vm63_vm4 = vcmp.ge.f32.partialorder %v60_v12, %v299_v1  ;;  %vm51_vm5 = vcmp.ge.f32.partialorder %v50_v16, %v294_v0  ;;  %vm52_vm6 = vcmp.ge.f32.partialorder %v49_v15, %v299_v1 }
  0x89   :  { %v64_v20 = vsel %vm62_vm3, 64, %v271_v19  ;;  %v65_v21 = vsel %vm63_vm4, 64, %v271_v19  ;;  %v53_v24 = vsel %vm51_vm5, 128, %v271_v19  ;;  %v54_v25 = vsel %vm52_vm6, 128, %v271_v19 }
  0x8a   :  { %v66_v30 = vadd.s32 %v64_v20, %v53_v24  ;;  %v67_v31 = vadd.s32 %v65_v21, %v54_v25  ;;  %vm124_vm0 = vcmp.lt.s32.totalorder %v314_v9, 112  ;;  %vm137_vm5 = vcmp.lt.s32.totalorder %v314_v9, 111 }
  0x8c   :  { %v79_v39 = vadd.s32 %v77_v33, %v66_v30  ;;  %v80_v40 = vadd.s32 %v78_v34, %v67_v31 }
  0x8e   :  { %v84_v10 = vpop.permute.xlu1 %83  ;;  %v82_v11 = vpop.permute.xlu0 %81 }
  0x8f   :  { %v86_v26 = vsel %vm85_vm7, %v82_v11, %v84_v10  ;;  %v87_v27 = vsel %vm85_vm7, %v84_v10, %v82_v11 }
  0x90   :  { %vm88_vm12 = vcmp.ge.f32.partialorder %v87_v27, %v294_v0  ;;  %vm89_vm13 = vcmp.ge.f32.partialorder %v86_v26, %v299_v1 }
  0x91   :  { %v90_v35 = vsel %vm88_vm12, 16, %v271_v19  ;;  %v91_v36 = vsel %vm89_vm13, 16, %v271_v19 }
  0x92   :  { %v92_v47 = vadd.s32 %v90_v35, %v79_v39  ;;  %v93_v48 = vadd.s32 %v91_v36, %v80_v40 }
  0x96   :  { %v108_v22 = vpop.permute.xlu1 %107  ;;  %v97_v23 = vpop.permute.xlu0 %96 }
  0x97   :  { %v99_v28 = vsel %vm98_vm8, %v95_v14, %v97_v23  ;;  %v100_v29 = vsel %vm98_vm8, %v97_v23, %v95_v14  ;;  %v112_v37 = vsel %vm111_vm11, %v108_v22, %v110_v32  ;;  %v113_v38 = vsel %vm111_vm11, %v110_v32, %v108_v22 }
  0x98   :  { %vm101_vm14 = vcmp.ge.f32.partialorder %v99_v28, %v294_v0  ;;  %vm102_vm15 = vcmp.ge.f32.partialorder %v100_v29, %v299_v1  ;;  %vm114_vm1 = vcmp.ge.f32.partialorder %v112_v37, %v294_v0  ;;  %vm115_vm2 = vcmp.ge.f32.partialorder %v113_v38, %v299_v1 }
  0x99   :  { %v103_v43 = vsel %vm101_vm14, 8, %v271_v19  ;;  %v104_v44 = vsel %vm102_vm15, 8, %v271_v19  ;;  %v116_v51 = vsel %vm114_vm1, 4, %v271_v19  ;;  %v117_v52 = vsel %vm115_vm2, 4, %v271_v19 }
  0x9a   :  { %v105_v49 = vadd.s32 %v103_v43, %v92_v47  ;;  %v106_v50 = vadd.s32 %v104_v44, %v93_v48 }
  0x9c   :  { %v118_v57 = vadd.s32 %v116_v51, %v105_v49  ;;  %v119_v58 = vadd.s32 %v117_v52, %v106_v50 }
  0x9e   :  { %v123_v41 = vpop.permute.xlu1 %122  ;;  %v121_v42 = vpop.permute.xlu0 %120 }
  0x9f   :  { %v125_v45 = vsel %vm124_vm0, %v121_v42, %v123_v41  ;;  %v126_v46 = vsel %vm124_vm0, %v123_v41, %v121_v42 }
  0xa0   :  { %vm127_vm3 = vcmp.ge.f32.partialorder %v125_v45, %v294_v0  ;;  %vm128_vm4 = vcmp.ge.f32.partialorder %v126_v46, %v299_v1 }
  0xa1   :  { %v129_v55 = vsel %vm127_vm3, 2, %v271_v19  ;;  %v130_v56 = vsel %vm128_vm4, 2, %v271_v19 }
  0xa2   :  { %v131_v2 = vadd.s32 %v129_v55, %v118_v57  ;;  %v132_v3 = vadd.s32 %v130_v56, %v119_v58 }
  0xa6   :  { %v136_v59 = vpop.permute.xlu0 %135 }
  0xa7   :  { %v138_v62 = vsel %vm137_vm5, %v134_v53, %v136_v59  ;;  %v139_v63 = vsel %vm137_vm5, %v136_v59, %v134_v53 }
  0xa8   :  { %vm140_vm6 = vcmp.ge.f32.partialorder %v138_v62, %v294_v0  ;;  %vm141_vm7 = vcmp.ge.f32.partialorder %v139_v63, %v299_v1 }
  0xa9   :  { %v142_v4 = vsel %vm140_vm6, 1, %v271_v19  ;;  %v143_v5 = vsel %vm141_vm7, 1, %v271_v19 }
  0xaa   :  { %v144_v6 = vadd.s32 %v142_v4, %v131_v2  ;;  %v145_v7 = vadd.s32 %v143_v5, %v132_v3 }
  0xac   :  { %v149_v8 = vmul.u32 %v147_v60, %v144_v6  ;;  %v150_v9 = vmul.u32 %v148_v61, %v145_v7 }
  0xae   :  { %151 = vst [vmem:[#allocation7] sm:$0xff] %v149_v8 }
  0xaf   :  { %152 = vst [vmem:[#allocation7 + $0x8] sm:$0xff] %v150_v9 }
  0xb0   :  { %163 = dma.vmem_to_hbm [thread:$0]  %s159_s26, 256, %s161_s29, [#allocation4]  }
  0xb1   :  { %259 = dma.done.wait [#allocation4], 256  }
  0xb2   :  { %260 = vsyncadd [#allocation4], 4294967040 }
  0xb3   :  { %168 = vsyncpa [#allocation3], 1 }
  0xb4   :  { %169 = vsyncpa [#allocation6], 1 }
  0xb5   :  { %170 = vsyncpa [#allocation4], 1 }

</bundles_post_ra>
